<compile_context>
chip_gen: v7x
topology: tpu7x:2x2x1
jax: 0.10.0
libtpu: 0.0.40
codegen_flags: <defaults>
</compile_context>

<pallas_src>
import functools

import jax
import jax.numpy as jnp
from jax.experimental import pallas as pl
from jax.experimental.pallas import tpu as pltpu

LRELU_SLOPE = 0.1
KSIZE = 3
DILATIONS = (1, 3)
# Halo rows needed per side: pad(dil=1) + pad(dil=3) = 4, rounded up to 8 so
# every slice / store offset stays sublane (8-row) aligned.
HALO = 8


def _resblock2_kernel(x_ref, halo_ref,
                      dw1_ref, pw1_ref, pb1_ref,
                      dw2_ref, pw2_ref, pb2_ref,
                      o_ref, *, t_len, t_tile):
    H, TT = HALO, t_tile
    L = TT + 2 * H
    j = pl.program_id(1)

    # Haloed working tile [lead halo | tile | trail halo]; all pieces are
    # sublane-aligned, so this is cheap vreg/VMEM layout work only.
    hal = halo_ref[0, 0]                                      # (2H, C)
    xb = jnp.concatenate([hal[:H], x_ref[0], hal[H:]], axis=0)  # (L, C)

    # Global validity of each local row: rows outside [0, T) must behave like
    # the convs' zero padding.
    r = jax.lax.broadcasted_iota(jnp.int32, (L, 1), 0)
    g = r + (j * TT - H)
    valid = jnp.logical_and(g >= 0, g < t_len)

    def block(x, dw_ref, pw_ref, pb_ref, dil):
        # leaky_relu (VPU)
        xt = jnp.where(x > 0, x, LRELU_SLOPE * x)
        # Depthwise dilated conv: taps via sublane rolls (XLU slot, no scratch
        # round-trip).  The halo guarantees every tap feeding a written row is
        # free of wrap-around; rows that could wrap are never stored.
        acc = xt * dw_ref[1, :][None, :]
        acc = acc + pltpu.roll(xt, shift=dil, axis=0) * dw_ref[0, :][None, :]
        acc = acc + pltpu.roll(xt, shift=L - dil, axis=0) * dw_ref[2, :][None, :]
        # Pointwise 1x1 conv == channel matmul on the MXU.  Weights arrive
        # pre-transposed to (Cin, Cout) and pre-cast to the matmul dtype; the
        # depthwise bias is already folded into pb.
        pw = pw_ref[...]
        y = jnp.dot(acc.astype(pw.dtype), pw,
                    preferred_element_type=jnp.float32)
        y = y + pb_ref[0][None, :]
        return x + y                                          # residual

    x1 = block(xb, dw1_ref, pw1_ref, pb1_ref, DILATIONS[0])
    # Rows beyond the real sequence must look like zeros to block 2's padding
    # (block 1's output there is bias-contaminated otherwise).
    x1 = jnp.where(valid, x1, 0.0)
    x2 = block(x1, dw2_ref, pw2_ref, pb2_ref, DILATIONS[1])

    o_ref[0] = x2[H:H + TT, :].astype(o_ref.dtype)


# ----------------------------------------------------------------------------
# Wrapper
# ----------------------------------------------------------------------------
def _pack_params(params, matmul_dtype):
    """Pre-transpose pw to (Cin, Cout), cast to the matmul dtype, and fold the
    depthwise bias into the pointwise bias (all pure wrapper math)."""
    packed = []
    for (w_dw, b_dw, w_pw, b_pw) in params:
        C = w_dw.shape[0]
        dw = jnp.transpose(w_dw[:, 0, :], (1, 0)).astype(jnp.float32)  # (K, C)
        pw = w_pw[:, :, 0].astype(jnp.float32)                         # (Cout, Cin)
        pw_t = jnp.transpose(pw, (1, 0)).astype(matmul_dtype)          # (Cin, Cout)
        # pb_eff[o] = b_pw[o] + sum_i b_dw[i] * pw[o, i]   (exact, no matmul)
        pb_eff = (b_pw + jnp.sum(pw * b_dw[None, :], axis=1)).reshape(1, C)
        packed += [dw, pw_t, pb_eff.astype(jnp.float32)]
    return packed


def _choose_t_tile(T, t_tile):
    tt = max(8, min(int(t_tile), T))
    tt -= tt % 8
    while T % tt != 0:
        tt -= 8
    return tt


def resblock2_forward(x_ntc, params, *, t_tile=512, matmul_dtype=jnp.bfloat16):
    """ResBlock2 forward.  x_ntc: (B, T, C) float32.  Returns (B, T, C)."""
    B, T, C = x_ntc.shape
    assert T % 8 == 0, "T must be a multiple of 8"
    x_ntc = x_ntc.astype(jnp.float32)
    tt = _choose_t_tile(T, t_tile)
    nT = T // tt
    H = HALO
    assert tt >= H and tt % 8 == 0

    packed = _pack_params(params, matmul_dtype)

    # Per-tile halo side-array (B, nT, 2H, C): lead halo rows then trail halo
    # rows.  Built from only ~2*H/tt of x; boundary tiles get zero halos, which
    # reproduces the convs' zero-padding semantics.
    xr = x_ntc.reshape(B, nT, tt, C)
    zrow = jnp.zeros((B, 1, H, C), jnp.float32)
    if nT > 1:
        lead = jnp.concatenate([zrow, xr[:, :-1, tt - H:, :]], axis=1)
        trail = jnp.concatenate([xr[:, 1:, :H, :], zrow], axis=1)
    else:
        lead, trail = zrow, zrow
    halos = jnp.concatenate([lead, trail], axis=2)            # (B, nT, 2H, C)

    wspec = lambda shape: pl.BlockSpec(shape, lambda b, t: (0, 0))
    grid_spec = pltpu.PrefetchScalarGridSpec(
        num_scalar_prefetch=0,
        grid=(B, nT),
        in_specs=[
            pl.BlockSpec((1, tt, C), lambda b, t: (b, t, 0)),           # x tile
            pl.BlockSpec((1, 1, 2 * H, C), lambda b, t: (b, t, 0, 0)),  # halos
            wspec((KSIZE, C)), wspec((C, C)), wspec((1, C)),            # block 1
            wspec((KSIZE, C)), wspec((C, C)), wspec((1, C)),            # block 2
        ],
        out_specs=pl.BlockSpec((1, tt, C), lambda b, t: (b, t, 0)),
    )

    kernel = functools.partial(_resblock2_kernel, t_len=T, t_tile=tt)
    return pl.pallas_call(
        kernel,
        out_shape=jax.ShapeDtypeStruct((B, T, C), jnp.float32),
        grid_spec=grid_spec,
        compiler_params=pltpu.CompilerParams(
            dimension_semantics=("parallel", "parallel")),
    )(x_ntc, halos, *packed)


def resblock2_forward_nct(x_nct, params, **kwargs):
    """PyTorch-layout convenience wrapper: (B, C, T) in / out.  Prefer calling
    resblock2_forward (NTC) end-to-end to avoid these two transpose passes."""
    x_ntc = jnp.transpose(x_nct, (0, 2, 1))
    out = resblock2_forward(x_ntc, params, **kwargs)
    return jnp.transpose(out, (0, 2, 1))


# ----------------------------------------------------------------------------
# Parameter construction (deterministic, synthetic) + pure-JAX reference
# ----------------------------------------------------------------------------
def _weight_norm(v, g):
    norm = jnp.sqrt(jnp.sum(v * v, axis=tuple(range(1, v.ndim)), keepdims=True))
    return g * v / norm


def make_params(key, channels):
    """Effective (post weight_norm) weights as per-block tuples
    (w_dw (C,1,K), b_dw (C,), w_pw (C,C,1), b_pw (C,))."""
    C, K = channels, KSIZE
    keys = jax.random.split(key, 12)
    params = []
    i = 0
    for _ in range(2):
        v_dw = 0.01 * jax.random.normal(keys[i], (C, 1, K), jnp.float32); i += 1
        g_dw = 1.0 + 0.01 * jax.random.normal(keys[i], (C, 1, 1), jnp.float32); i += 1
        b_dw = 0.01 * jax.random.normal(keys[i], (C,), jnp.float32); i += 1
        v_pw = 0.01 * jax.random.normal(keys[i], (C, C, 1), jnp.float32); i += 1
        g_pw = 1.0 + 0.01 * jax.random.normal(keys[i], (C, 1, 1), jnp.float32); i += 1
        b_pw = 0.01 * jax.random.normal(keys[i], (C,), jnp.float32); i += 1
        params.append((_weight_norm(v_dw, g_dw), b_dw,
                       _weight_norm(v_pw, g_pw), b_pw))
    return params


def reference_forward(x_nct, params):
    """Pure-JAX reference matching PyTorch ResBlock2.forward on NCT input."""
    B, C, T = x_nct.shape
    x = x_nct
    for (w_dw, b_dw, w_pw, b_pw), dil in zip(params, DILATIONS):
        pad = (KSIZE - 1) * dil // 2
        xt = jnp.where(x > 0, x, LRELU_SLOPE * x)
        xp = jnp.pad(xt, ((0, 0), (0, 0), (pad, pad)))
        dw_out = sum(
            xp[:, :, k * dil:k * dil + T] * w_dw[None, :, 0, k, None]
            for k in range(KSIZE)
        ) + b_dw[None, :, None]
        pw_out = jnp.einsum('oi,nit->not', w_pw[:, :, 0], dw_out) \
            + b_pw[None, :, None]
        x = pw_out + x
    return x


if __name__ == "__main__":
    B, C, T = 2, 4, 16
    key = jax.random.PRNGKey(0)
    k_x, k_p = jax.random.split(key)
    x_nct = jax.random.normal(k_x, (B, C, T), jnp.float32)
    params = make_params(k_p, C)

    ref = jax.block_until_ready(reference_forward(x_nct, params))

    # f32 matmul path, two halo'd T tiles (t_tile=8 -> exercises cross-tile
    # halos and boundary masking): exact check against the PyTorch reference.
    out_f32 = jax.block_until_ready(
        resblock2_forward_nct(x_nct, params, t_tile=8,
                              matmul_dtype=jnp.float32))
    assert out_f32.shape == (B, C, T)
    err = float(jnp.max(jnp.abs(out_f32 - ref)))
    assert jnp.allclose(out_f32, ref, atol=1e-4, rtol=1e-4), f"f32 max err {err}"

    # Single-tile path (t_tile=T, nT=1): exercises the zero-halo branch.
    out_one = jax.block_until_ready(
        resblock2_forward_nct(x_nct, params, t_tile=T,
                              matmul_dtype=jnp.float32))
    err1 = float(jnp.max(jnp.abs(out_one - ref)))
    assert jnp.allclose(out_one, ref, atol=1e-4, rtol=1e-4), f"1-tile err {err1}"

    # bf16 matmul path (production default: ~2x MXU throughput on v6e/v7x and
    # half the weight DMA).  Exactness is proven by the f32 paths above; here
    # we only sanity-check the low-precision path.
    out_bf16 = jax.block_until_ready(
        resblock2_forward_nct(x_nct, params, t_tile=8))
    assert out_bf16.shape == (B, C, T)
    assert bool(jnp.all(jnp.isfinite(out_bf16)))
    mad = float(jnp.mean(jnp.abs(out_bf16 - ref)))
    assert mad < 0.1, f"bf16 mean abs diff {mad}"

    print("KERNEL_OK")
</pallas_src>

<mosaic_0001>
module attributes {stable_mosaic.version = 11 : i64} {
  func.func @_resblock2_kernel(%arg0: i32, %arg1: i32, %arg2: memref<1x8x4xf32, #tpu.memory_space<vmem>>, %arg3: memref<1x1x16x4xf32, #tpu.memory_space<vmem>>, %arg4: memref<3x4xf32, #tpu.memory_space<vmem>>, %arg5: memref<4x4xf32, #tpu.memory_space<vmem>>, %arg6: memref<1x4xf32, #tpu.memory_space<vmem>>, %arg7: memref<3x4xf32, #tpu.memory_space<vmem>>, %arg8: memref<4x4xf32, #tpu.memory_space<vmem>>, %arg9: memref<1x4xf32, #tpu.memory_space<vmem>>, %arg10: memref<1x8x4xf32, #tpu.memory_space<vmem>>) attributes {dimension_semantics = [#tpu.dimension_semantics<parallel>, #tpu.dimension_semantics<parallel>], iteration_bounds = array<i64: 2, 2>, scalar_prefetch = 0 : i64, scratch_operands = 0 : i64, tpu.core_type = #tpu.core_type<tc>, window_params = [{transform_indices = @transform_0, window_bounds = array<i64: 1, 8, 4>}, {transform_indices = @transform_1, window_bounds = array<i64: 1, 1, 16, 4>}, {pipeline_mode = #tpu.pipeline_mode<synchronous>, transform_indices = @transform_2, window_bounds = array<i64: 3, 4>}, {pipeline_mode = #tpu.pipeline_mode<synchronous>, transform_indices = @transform_3, window_bounds = array<i64: 4, 4>}, {pipeline_mode = #tpu.pipeline_mode<synchronous>, transform_indices = @transform_4, window_bounds = array<i64: 1, 4>}, {pipeline_mode = #tpu.pipeline_mode<synchronous>, transform_indices = @transform_5, window_bounds = array<i64: 3, 4>}, {pipeline_mode = #tpu.pipeline_mode<synchronous>, transform_indices = @transform_6, window_bounds = array<i64: 4, 4>}, {pipeline_mode = #tpu.pipeline_mode<synchronous>, transform_indices = @transform_7, window_bounds = array<i64: 1, 4>}, {transform_indices = @transform_8, window_bounds = array<i64: 1, 8, 4>}]} {
    %c0 = arith.constant 0 : index
    %c0_0 = arith.constant 0 : index
    %c0_1 = arith.constant 0 : index
    %c0_2 = arith.constant 0 : index
    %0 = vector.load %arg3[%c0, %c0_0, %c0_1, %c0_2] : memref<1x1x16x4xf32, #tpu.memory_space<vmem>>, vector<1x1x16x4xf32>
    %1 = vector.shape_cast %0 : vector<1x1x16x4xf32> to vector<16x4xf32>
    %2 = vector.extract_strided_slice %1 {offsets = [0, 0], sizes = [8, 4], strides = [1, 1]} : vector<16x4xf32> to vector<8x4xf32>
    %c0_3 = arith.constant 0 : index
    %c0_4 = arith.constant 0 : index
    %c0_5 = arith.constant 0 : index
    %3 = vector.load %arg2[%c0_3, %c0_4, %c0_5] : memref<1x8x4xf32, #tpu.memory_space<vmem>>, vector<1x8x4xf32>
    %4 = vector.shape_cast %3 : vector<1x8x4xf32> to vector<8x4xf32>
    %5 = vector.extract_strided_slice %1 {offsets = [8, 0], sizes = [8, 4], strides = [1, 1]} : vector<16x4xf32> to vector<8x4xf32>
    %6 = tpu.concatenate %2, %4, %5 in 0 : vector<8x4xf32>, vector<8x4xf32>, vector<8x4xf32> -> vector<24x4xf32>
    %7 = tpu.iota {dimensions = array<i32: 0>} : vector<24x1xi32>
    %c8_i32 = arith.constant 8 : i32
    %8 = arith.muli %arg1, %c8_i32 : i32
    %c8_i32_6 = arith.constant 8 : i32
    %9 = arith.subi %8, %c8_i32_6 : i32
    %10 = vector.broadcast %9 : i32 to vector<24x1xi32>
    %11 = arith.addi %7, %10 : vector<24x1xi32>
    %c0_i32 = arith.constant 0 : i32
    %12 = vector.broadcast %c0_i32 : i32 to vector<24x1xi32>
    %13 = arith.cmpi sge, %11, %12 : vector<24x1xi32>
    %c16_i32 = arith.constant 16 : i32
    %14 = vector.broadcast %c16_i32 : i32 to vector<24x1xi32>
    %15 = arith.cmpi slt, %11, %14 : vector<24x1xi32>
    %16 = arith.andi %13, %15 : vector<24x1xi1>
    %cst = arith.constant 0.000000e+00 : f32
    %17 = vector.broadcast %cst : f32 to vector<24x4xf32>
    %18 = arith.cmpf ogt, %6, %17 : vector<24x4xf32>
    %cst_7 = arith.constant 1.000000e-01 : f32
    %19 = vector.broadcast %cst_7 : f32 to vector<24x4xf32>
    %20 = arith.mulf %19, %6 : vector<24x4xf32>
    %21 = arith.select %18, %6, %20 : vector<24x4xi1>, vector<24x4xf32>
    %c1 = arith.constant 1 : index
    %c0_8 = arith.constant 0 : index
    %22 = vector.load %arg4[%c1, %c0_8] : memref<3x4xf32, #tpu.memory_space<vmem>>, vector<1x4xf32>
    %23 = vector.shape_cast %22 : vector<1x4xf32> to vector<4xf32>
    %24 = vector.shape_cast %23 : vector<4xf32> to vector<1x4xf32>
    %25 = vector.broadcast %24 : vector<1x4xf32> to vector<24x4xf32>
    %26 = arith.mulf %21, %25 : vector<24x4xf32>
    %c1_i32 = arith.constant 1 : i32
    %27 = tpu.dynamic_rotate %21 by %c1_i32 dim 0 : vector<24x4xf32>, i32 -> vector<24x4xf32>
    %c0_9 = arith.constant 0 : index
    %c0_10 = arith.constant 0 : index
    %28 = vector.load %arg4[%c0_9, %c0_10] : memref<3x4xf32, #tpu.memory_space<vmem>>, vector<1x4xf32>
    %29 = vector.shape_cast %28 : vector<1x4xf32> to vector<4xf32>
    %30 = vector.shape_cast %29 : vector<4xf32> to vector<1x4xf32>
    %31 = vector.broadcast %30 : vector<1x4xf32> to vector<24x4xf32>
    %32 = arith.mulf %27, %31 : vector<24x4xf32>
    %33 = arith.addf %26, %32 : vector<24x4xf32>
    %c23_i32 = arith.constant 23 : i32
    %34 = tpu.dynamic_rotate %21 by %c23_i32 dim 0 : vector<24x4xf32>, i32 -> vector<24x4xf32>
    %c2 = arith.constant 2 : index
    %c0_11 = arith.constant 0 : index
    %35 = vector.load %arg4[%c2, %c0_11] : memref<3x4xf32, #tpu.memory_space<vmem>>, vector<1x4xf32>
    %36 = vector.shape_cast %35 : vector<1x4xf32> to vector<4xf32>
    %37 = vector.shape_cast %36 : vector<4xf32> to vector<1x4xf32>
    %38 = vector.broadcast %37 : vector<1x4xf32> to vector<24x4xf32>
    %39 = arith.mulf %34, %38 : vector<24x4xf32>
    %40 = arith.addf %33, %39 : vector<24x4xf32>
    %c0_12 = arith.constant 0 : index
    %c0_13 = arith.constant 0 : index
    %41 = vector.load %arg5[%c0_12, %c0_13] : memref<4x4xf32, #tpu.memory_space<vmem>>, vector<4x4xf32>
    %cst_14 = arith.constant dense<0.000000e+00> : vector<24x4xf32>
    %42 = tpu.matmul %40, %41, %cst_14 {dimension_numbers = #tpu.dot_dimension_numbers<[1], [0], [0], [1], [0, 0, 1, 1], [], []>} : vector<24x4xf32>, vector<4x4xf32>, vector<24x4xf32> -> vector<24x4xf32>
    %c0_15 = arith.constant 0 : index
    %c0_16 = arith.constant 0 : index
    %43 = vector.load %arg6[%c0_15, %c0_16] : memref<1x4xf32, #tpu.memory_space<vmem>>, vector<1x4xf32>
    %44 = vector.shape_cast %43 : vector<1x4xf32> to vector<4xf32>
    %45 = vector.shape_cast %44 : vector<4xf32> to vector<1x4xf32>
    %46 = vector.broadcast %45 : vector<1x4xf32> to vector<24x4xf32>
    %47 = arith.addf %42, %46 : vector<24x4xf32>
    %48 = arith.addf %6, %47 : vector<24x4xf32>
    %cst_17 = arith.constant 0.000000e+00 : f32
    %49 = vector.shape_cast %16 : vector<24x1xi1> to vector<24x1xi1>
    %50 = vector.broadcast %49 : vector<24x1xi1> to vector<24x4xi1>
    %51 = vector.broadcast %cst_17 : f32 to vector<24x4xf32>
    %52 = arith.select %50, %48, %51 : vector<24x4xi1>, vector<24x4xf32>
    %cst_18 = arith.constant 0.000000e+00 : f32
    %53 = vector.broadcast %cst_18 : f32 to vector<24x4xf32>
    %54 = arith.cmpf ogt, %52, %53 : vector<24x4xf32>
    %cst_19 = arith.constant 1.000000e-01 : f32
    %55 = vector.broadcast %cst_19 : f32 to vector<24x4xf32>
    %56 = arith.mulf %55, %52 : vector<24x4xf32>
    %57 = arith.select %54, %52, %56 : vector<24x4xi1>, vector<24x4xf32>
    %c1_20 = arith.constant 1 : index
    %c0_21 = arith.constant 0 : index
    %58 = vector.load %arg7[%c1_20, %c0_21] : memref<3x4xf32, #tpu.memory_space<vmem>>, vector<1x4xf32>
    %59 = vector.shape_cast %58 : vector<1x4xf32> to vector<4xf32>
    %60 = vector.shape_cast %59 : vector<4xf32> to vector<1x4xf32>
    %61 = vector.broadcast %60 : vector<1x4xf32> to vector<24x4xf32>
    %62 = arith.mulf %57, %61 : vector<24x4xf32>
    %c3_i32 = arith.constant 3 : i32
    %63 = tpu.dynamic_rotate %57 by %c3_i32 dim 0 : vector<24x4xf32>, i32 -> vector<24x4xf32>
    %c0_22 = arith.constant 0 : index
    %c0_23 = arith.constant 0 : index
    %64 = vector.load %arg7[%c0_22, %c0_23] : memref<3x4xf32, #tpu.memory_space<vmem>>, vector<1x4xf32>
    %65 = vector.shape_cast %64 : vector<1x4xf32> to vector<4xf32>
    %66 = vector.shape_cast %65 : vector<4xf32> to vector<1x4xf32>
    %67 = vector.broadcast %66 : vector<1x4xf32> to vector<24x4xf32>
    %68 = arith.mulf %63, %67 : vector<24x4xf32>
    %69 = arith.addf %62, %68 : vector<24x4xf32>
    %c21_i32 = arith.constant 21 : i32
    %70 = tpu.dynamic_rotate %57 by %c21_i32 dim 0 : vector<24x4xf32>, i32 -> vector<24x4xf32>
    %c2_24 = arith.constant 2 : index
    %c0_25 = arith.constant 0 : index
    %71 = vector.load %arg7[%c2_24, %c0_25] : memref<3x4xf32, #tpu.memory_space<vmem>>, vector<1x4xf32>
    %72 = vector.shape_cast %71 : vector<1x4xf32> to vector<4xf32>
    %73 = vector.shape_cast %72 : vector<4xf32> to vector<1x4xf32>
    %74 = vector.broadcast %73 : vector<1x4xf32> to vector<24x4xf32>
    %75 = arith.mulf %70, %74 : vector<24x4xf32>
    %76 = arith.addf %69, %75 : vector<24x4xf32>
    %c0_26 = arith.constant 0 : index
    %c0_27 = arith.constant 0 : index
    %77 = vector.load %arg8[%c0_26, %c0_27] : memref<4x4xf32, #tpu.memory_space<vmem>>, vector<4x4xf32>
    %cst_28 = arith.constant dense<0.000000e+00> : vector<24x4xf32>
    %78 = tpu.matmul %76, %77, %cst_28 {dimension_numbers = #tpu.dot_dimension_numbers<[1], [0], [0], [1], [0, 0, 1, 1], [], []>} : vector<24x4xf32>, vector<4x4xf32>, vector<24x4xf32> -> vector<24x4xf32>
    %c0_29 = arith.constant 0 : index
    %c0_30 = arith.constant 0 : index
    %79 = vector.load %arg9[%c0_29, %c0_30] : memref<1x4xf32, #tpu.memory_space<vmem>>, vector<1x4xf32>
    %80 = vector.shape_cast %79 : vector<1x4xf32> to vector<4xf32>
    %81 = vector.shape_cast %80 : vector<4xf32> to vector<1x4xf32>
    %82 = vector.broadcast %81 : vector<1x4xf32> to vector<24x4xf32>
    %83 = arith.addf %78, %82 : vector<24x4xf32>
    %84 = arith.addf %52, %83 : vector<24x4xf32>
    %85 = vector.extract_strided_slice %84 {offsets = [8, 0], sizes = [8, 4], strides = [1, 1]} : vector<24x4xf32> to vector<8x4xf32>
    %c0_31 = arith.constant 0 : index
    %c0_32 = arith.constant 0 : index
    %c0_33 = arith.constant 0 : index
    %86 = vector.load %arg10[%c0_31, %c0_32, %c0_33] : memref<1x8x4xf32, #tpu.memory_space<vmem>>, vector<1x8x4xf32>
    %87 = vector.shape_cast %86 : vector<1x8x4xf32> to vector<8x4xf32>
    %88 = vector.shape_cast %85 : vector<8x4xf32> to vector<1x8x4xf32>
    tpu.vector_store %arg10[%c0_31, %c0_32, %c0_33], %88 {strides = array<i32>} : memref<1x8x4xf32, #tpu.memory_space<vmem>>, vector<1x8x4xf32>,
    return
  }
  func.func @transform_0(%arg0: i32, %arg1: i32) -> (i32, i32, i32) {
    %c0_i32 = arith.constant 0 : i32
    %c0_i32_0 = arith.constant 0 : i32
    return %arg0, %arg1, %c0_i32 : i32, i32, i32
  }
  func.func @transform_1(%arg0: i32, %arg1: i32) -> (i32, i32, i32, i32) {
    %c0_i32 = arith.constant 0 : i32
    %c0_i32_0 = arith.constant 0 : i32
    %c0_i32_1 = arith.constant 0 : i32
    return %arg0, %arg1, %c0_i32, %c0_i32_0 : i32, i32, i32, i32
  }
  func.func @transform_2(%arg0: i32, %arg1: i32) -> (i32, i32) {
    %c0_i32 = arith.constant 0 : i32
    %c0_i32_0 = arith.constant 0 : i32
    %c0_i32_1 = arith.constant 0 : i32
    return %c0_i32, %c0_i32_0 : i32, i32
  }
  func.func @transform_3(%arg0: i32, %arg1: i32) -> (i32, i32) {
    %c0_i32 = arith.constant 0 : i32
    %c0_i32_0 = arith.constant 0 : i32
    %c0_i32_1 = arith.constant 0 : i32
    return %c0_i32, %c0_i32_0 : i32, i32
  }
  func.func @transform_4(%arg0: i32, %arg1: i32) -> (i32, i32) {
    %c0_i32 = arith.constant 0 : i32
    %c0_i32_0 = arith.constant 0 : i32
    %c0_i32_1 = arith.constant 0 : i32
    return %c0_i32, %c0_i32_0 : i32, i32
  }
  func.func @transform_5(%arg0: i32, %arg1: i32) -> (i32, i32) {
    %c0_i32 = arith.constant 0 : i32
    %c0_i32_0 = arith.constant 0 : i32
    %c0_i32_1 = arith.constant 0 : i32
    return %c0_i32, %c0_i32_0 : i32, i32
  }
  func.func @transform_6(%arg0: i32, %arg1: i32) -> (i32, i32) {
    %c0_i32 = arith.constant 0 : i32
    %c0_i32_0 = arith.constant 0 : i32
    %c0_i32_1 = arith.constant 0 : i32
    return %c0_i32, %c0_i32_0 : i32, i32
  }
  func.func @transform_7(%arg0: i32, %arg1: i32) -> (i32, i32) {
    %c0_i32 = arith.constant 0 : i32
    %c0_i32_0 = arith.constant 0 : i32
    %c0_i32_1 = arith.constant 0 : i32
    return %c0_i32, %c0_i32_0 : i32, i32
  }
  func.func @transform_8(%arg0: i32, %arg1: i32) -> (i32, i32, i32) {
    %c0_i32 = arith.constant 0 : i32
    %c0_i32_0 = arith.constant 0 : i32
    return %arg0, %arg1, %c0_i32 : i32, i32, i32
  }
}

</mosaic_0001>

<bundles_post_ra>
// kernel: tpu_custom_call.1
= control target key start
LH: loop header
LB: loop body
LE: loop exit
PB: predicated region body
PF: predicated region fallthrough
CT: control target
= control target key end

     0   :  { %s1011_s27 = smov 0   ;;  %s1013_s28 = smov 0   ;;  %s1175_s0 = inlined_call_operand.vmem [shape: f32[2,16,4], index: 0, kind: input, shape index: {}]   ;;  %s1176_s1 = inlined_call_operand.vmem [shape: f32[2,2,16,4], index: 1, kind: input, shape index: {}]   ;;  %s1177_s2 = inlined_call_operand.vmem [shape: f32[3,4], index: 2, kind: input, shape index: {}]   ;;  %s1178_s3 = inlined_call_operand.vmem [shape: f32[4,4], index: 3, kind: input, shape index: {}]   ;;  %s1179_s4 = inlined_call_operand.vmem [shape: f32[1,4], index: 4, kind: input, shape index: {}]   ;;  %s1180_s5 = inlined_call_operand.vmem [shape: f32[3,4], index: 5, kind: input, shape index: {}]   ;;  %s1181_s6 = inlined_call_operand.vmem [shape: f32[4,4], index: 6, kind: input, shape index: {}]   ;;  %s1182_s7 = inlined_call_operand.vmem [shape: f32[1,4], index: 7, kind: input, shape index: {}]   ;;  %s1183_s8 = inlined_call_operand.vmem [shape: f32[2,16,4], index: 8, kind: output, shape index: {}]  }
   0x1   :  { %s1015_s29 = smov 0   ;;  %s1017_s30 = smov 0  }
   0x2   :  { %s1019_s9 = smov 0  }
   0x3 LB: > { %s27_s10 = sadd.s32 1, %s954_s29  ;;  %s30_s11 = sadd.s32 1, %s958_s30  ;;  %s962_s9 = sphi %s1019_s9, %s18_s9   ;;  %s958_s30 = sphi %s1017_s30, %s1187_s30   ;;  %s954_s29 = sphi %s1015_s29, %s1186_s29   ;;  %s950_s28 = sphi %s1013_s28, %s1185_s28   ;;  %s946_s27 = sphi %s1011_s27, %s1184_s27  }
   0x4   : > { %p28_p0 = scmp.ge.s32.totalorder %s27_s10, 2  ;;  %p824_p1 = scmp.ge.s32.totalorder %s962_s9, 1 }
   0x5   : > { %p297_p2 = scmp.lt.s32.totalorder %s962_s9, 5 }
   0x6   : > { %s1189_s10 = smov (%p28_p0, %s27_s10), 0  ;;  %s1191_s11 = smov (!%p28_p0, %s30_s11), %s958_s30 }
   0x7   : > { %p298_p3 = pnand %p824_p1, %p297_p2  ;;  %p32_p4 = scmp.ge.s32.totalorder %s1191_s11, 2 }
   0x8   : > { %v446_v0 = vld [vmem:[%s1178_s3] sm:$0xf] (!%p298_p3)  ;;  %vm464_vm0 = vcmask (!%p298_p3), 1043456   ;;  %p346_p5 = scmp.lt.s32.totalorder (!%p298_p3), %s950_s28, 1  ;;  %v964_v1 = vmov (!%p298_p3), 0.0   ;;  %vm965_vm1 = vmmov (!%p298_p3), 0   ;;  %v374_v2 = vlaneseq (!%p298_p3) }
   0x9   : > { %s1193_s11 = smov (%p32_p4, %s1191_s11), 0  ;;  %301 = sbr.rel (%p298_p3) target bundleno = 494 (0x1ee), region = 52 }
   0xa   : > { %860 = vmatprep.subr.mxu0 (!%p298_p3), %v964_v1  ;;  %862 = vmatprep.mubr.msk.f32.mxu0 (!%p298_p3), %vm965_vm1, %v964_v1  ;;  %p348_p6 = scmp.lt.s32.totalorder (!%p298_p3), %s946_s27, 1  ;;  %v1063_v3 = vshrl.u32 (!%p298_p3), %v374_v2, 7  ;;  %v834_v11 = vld [vmem:[%s1177_s2 + $0x1] ss:$0 sm:$0xff] (!%p298_p3)  ;;  %v835_v14 = vld [vmem:[%s1177_s2] ss:$0 sm:$0xff] (!%p298_p3) }
   0xb   : > { %861 = vmatpush3.msk.msra.mxu0 (!%p298_p3), %vm464_vm0, %v446_v0  ;;  %871 = vmatprep.subr.mxu1 (!%p298_p3), %v964_v1  ;;  %v836_v19 = vld [vmem:[%s1177_s2 + $0x2] ss:$0 sm:$0xff] (!%p298_p3)  ;;  %vm454_vm7 = vcmask (!%p298_p3), 31744   ;;  %s832_s22 = sshll.u32 (!%p298_p3), %s946_s27, 3  ;;  %v837_v47 = vld [vmem:[%s1179_s4] ss:$0 sm:$0xff] (!%p298_p3) }
   0xc   : > { %873 = vmatprep.mubr.msk.f32.mxu1 (!%p298_p3), %vm965_vm1, %v964_v1  ;;  %vm413_vm5 = vcmp.lt.s32.totalorder (!%p298_p3), %v1063_v3, 1  ;;  %vm431_vm6 = vcmp.lt.s32.totalorder (!%p298_p3), %v1063_v3, 7  ;;  %v613_v43 = vld [vmem:[%s1181_s6] sm:$0xf] (!%p298_p3)  ;;  %v376_v46 = vadd.s32 (!%p298_p3), 8, %v1063_v3  ;;  %v377_v50 = vadd.s32 (!%p298_p3), 16, %v1063_v3 }
   0xd   : > { %872 = vmatpush3.msk.msra.mxu1 (!%p298_p3), %vm464_vm0, %v613_v43 }
  0x10   : > { %s1195_s28 = smov (!%p346_p5, %s950_s28), 1 }
  0x11   : > { %s349_s14 = scalar_select %p348_p6, %s946_s27, 1 }
  0x12   : > { %s825_s15 = sshll.u32 %s1195_s28, 1  ;;  %s828_s16 = sshll.u32 %s1195_s28, 2 }
  0x13   : > { %s1055_s17 = sadd.s32 %s825_s15, %s349_s14  ;;  %s827_s18 = sshll.u32 %s349_s14, 1 }
  0x14   : > { %s826_s19 = sshll.u32 %s1055_s17, 3  ;;  %s360_s20 = sadd.s32 %s828_s16, %s827_s18 }
  0x15   : > { %s353_s23 = scalar_lea.vmem %s1175_s0, %s826_s19  ;;  %s829_s24 = sshll.u32 %s360_s20, 3 }
  0x16   : > { %s362_s12 = scalar_lea.vmem %s1176_s1, %s829_s24  ;;  %v1068_v4 = vld [vmem:[%s353_s23] sm:$0xff]  ;;  %s833_s23 = sadd.s32 4294967288, %s832_s22 }
  0x17   : > { %v1070_v5 = vld [vmem:[%s362_s12] sm:$0xff]  ;;  %v1072_v6 = vld [vmem:[%s362_s12 + $0x8] sm:$0xff]  ;;  %vm394_vm2 = vcmp.gt.f32.partialorder %v1068_v4, 0.0  ;;  %v397_v7 = vmul.f32 0.1, %v1068_v4  ;;  %v380_v44 = vstv %s833_s23  ;;  %s370_s21 = scalar_lea.vmem %s1183_s8, %s826_s19 }
  0x18   : > { %vm393_vm3 = vcmp.gt.f32.partialorder %v1070_v5, 0.0  ;;  %vm395_vm4 = vcmp.gt.f32.partialorder %v1072_v6, 0.0  ;;  %v396_v8 = vmul.f32 0.1, %v1070_v5  ;;  %v398_v9 = vmul.f32 0.1, %v1072_v6 }
  0x19   : > { %v400_v10 = vsel %vm394_vm2, %v1068_v4, %v397_v7  ;;  %v381_v45 = vadd.s32 %v380_v44, %v1063_v3  ;;  %v382_v48 = vadd.s32 %v380_v44, %v376_v46  ;;  %v383_v55 = vadd.s32 %v380_v44, %v377_v50 }
  0x1a   : > { %v399_v12 = vsel %vm393_vm3, %v1070_v5, %v396_v8  ;;  %v401_v13 = vsel %vm395_vm4, %v1072_v6, %v398_v9  ;;  %v429_v15 = vrot.slane %v400_v10, 1  ;;  %v411_v21 = vrot.slane %v400_v10, 7 }
  0x1b   : > { %v410_v16 = vrot.slane %v399_v12, 7  ;;  %v412_v17 = vrot.slane %v401_v13, 7  ;;  %v428_v18 = vrot.slane %v399_v12, 1  ;;  %v407_v20 = vmul.f32 %v834_v11, %v399_v12 }
  0x1c   : > { %v430_v22 = vrot.slane %v401_v13, 1  ;;  %v408_v25 = vmul.f32 %v834_v11, %v400_v10  ;;  %v409_v34 = vmul.f32 %v834_v11, %v401_v13  ;;  %vm384_vm8 = vcmp.ge.s32.totalorder %v381_v45, 0 }
  0x1d   : > { %v416_v23 = vsel %vm413_vm5, %v412_v17, %v410_v16  ;;  %v433_v24 = vsel %vm431_vm6, %v428_v18, %v429_v15  ;;  %v415_v28 = vsel %vm413_vm5, %v410_v16, %v411_v21  ;;  %v414_v31 = vsel %vm413_vm5, %v411_v21, %v412_v17 }
  0x1e   : > { %v422_v26 = vmul.f32 %v835_v14, %v416_v23  ;;  %v440_v27 = vmul.f32 %v836_v19, %v433_v24  ;;  %v432_v29 = vsel %vm431_vm6, %v429_v15, %v430_v22  ;;  %v423_v30 = vmul.f32 %v835_v14, %v415_v28  ;;  %v842_v15 = vld [vmem:[%s1180_s5 + $0x1] ss:$0 sm:$0xff]  ;;  %v844_v24 = vld [vmem:[%s1180_s5 + $0x2] ss:$0 sm:$0xff] }
  0x1f   : > { %v441_v33 = vmul.f32 %v836_v19, %v432_v29  ;;  %v424_v35 = vmul.f32 %v835_v14, %v414_v31  ;;  %v434_v37 = vsel %vm431_vm6, %v430_v22, %v428_v18  ;;  %vm387_vm9 = vcmp.lt.s32.totalorder %v381_v45, 16 }
  0x20   : > { %v425_v32 = vadd.f32 %v422_v26, %v407_v20  ;;  %v426_v36 = vadd.f32 %v423_v30, %v408_v25  ;;  %v442_v41 = vmul.f32 %v836_v19, %v434_v37  ;;  %vm390_vm10 = vmand %vm384_vm8, %vm387_vm9  ;;  %vm385_vm11 = vcmp.ge.s32.totalorder %v382_v48, 0 }
  0x21   : > { %v427_v40 = vadd.f32 %v424_v35, %v409_v34  ;;  %vm388_vm12 = vcmp.lt.s32.totalorder %v382_v48, 16  ;;  %vm386_vm15 = vcmp.ge.s32.totalorder %v383_v55, 0  ;;  %vm389_vm0 = vcmp.lt.s32.totalorder %v383_v55, 16 }
  0x22   : > { %v443_v38 = vadd.f32 %v440_v27, %v425_v32  ;;  %v444_v39 = vadd.f32 %v441_v33, %v426_v36  ;;  %vm391_vm13 = vmand %vm385_vm11, %vm388_vm12  ;;  %vm580_vm4 = vcmp.lt.s32.totalorder %v1063_v3, 3  ;;  %vm598_vm6 = vcmp.lt.s32.totalorder %v1063_v3, 5 }
  0x23   : > { %v445_v42 = vadd.f32 %v442_v41, %v427_v40  ;;  %vm392_vm3 = vmand %vm386_vm15, %vm389_vm0  ;;  %v845_v41 = vld [vmem:[%s1182_s7] ss:$0 sm:$0xff] }
  0x24   : > { %863 = vmatmul.mubr.msk.f32.vlgmr.msra.gmra.mrb[0].mxu0 %vm454_vm7, %v443_v38 }
  0x25   : > { %865 = vmatprep.mubr.msk.f32.mxu0 %vm965_vm1, %v964_v1 }
  0x28   : > { %866 = vmatmul.mubr.msk.f32.gmra.mrb[2].mxu0 %vm454_vm7, %v444_v39 }
  0x29   : > { %868 = vmatprep.mubr.msk.f32.mxu0 %vm965_vm1, %v964_v1 }
  0x2c   : > { %869 = vmatmul.mubr.msk.f32.gmra.mrb[4].mxu0 %vm454_vm7, %v445_v42 }
  0xf7   : > { %v534_v49 = vpop.f32.mrb[0].mxu0 }
  0xf8   : > { %v535_v51 = vadd.f32 %v837_v47, %v534_v49  ;;  %v864_v52 = vpop.f32.mrb[1].mxu0 }
  0xfa   : > { %v548_v53 = vadd.f32 %v535_v51, %v1070_v5 }
  0xfb   : > { %v539_v54 = vpop.f32.mrb[2].mxu0 }
  0xfc   : > { %v557_v56 = vsel %vm390_vm10, %v548_v53, 0.0  ;;  %v540_v57 = vadd.f32 %v837_v47, %v539_v54  ;;  %v867_v58 = vpop.f32.mrb[3].mxu0 }
  0xfd   : > { %v563_v59 = vmul.f32 0.1, %v557_v56  ;;  %vm560_vm14 = vcmp.gt.f32.partialorder %v557_v56, 0.0 }
  0xfe   : > { %v549_v60 = vadd.f32 %v540_v57, %v1068_v4  ;;  %v843_v4 = vld [vmem:[%s1180_s5] ss:$0 sm:$0xff] }
  0xff   : > { %v544_v61 = vpop.f32.mrb[4].mxu0  ;;  %v566_v0 = vsel %vm560_vm14, %v557_v56, %v563_v59 }
 0x100   : > { %v558_v62 = vsel %vm391_vm13, %v549_v60, 0.0  ;;  %v870_v63 = vpop.f32.mrb[5].mxu0  ;;  %v545_v5 = vadd.f32 %v837_v47, %v544_v61  ;;  %v577_v9 = vrot.slane %v566_v0, 5  ;;  %v574_v20 = vmul.f32 %v842_v15, %v566_v0 }
 0x101   : > { %vm561_vm2 = vcmp.gt.f32.partialorder %v558_v62, 0.0  ;;  %v564_v2 = vmul.f32 0.1, %v558_v62 }
 0x102   : > { %v550_v8 = vadd.f32 %v545_v5, %v1072_v6  ;;  %v595_v6 = vrot.slane %v566_v0, 3 }
 0x103   : > { %v567_v7 = vsel %vm561_vm2, %v558_v62, %v564_v2 }
 0x104   : > { %v578_v10 = vrot.slane %v567_v7, 5  ;;  %v559_v11 = vsel %vm392_vm3, %v550_v8, 0.0  ;;  %v596_v12 = vrot.slane %v567_v7, 3  ;;  %v575_v21 = vmul.f32 %v842_v15, %v567_v7 }
 0x105   : > { %vm562_vm5 = vcmp.gt.f32.partialorder %v559_v11, 0.0  ;;  %v565_v13 = vmul.f32 0.1, %v559_v11 }
 0x106   : > { %v582_v14 = vsel %vm580_vm4, %v577_v9, %v578_v10  ;;  %v600_v23 = vsel %vm598_vm6, %v595_v6, %v596_v12 }
 0x107   : > { %v568_v16 = vsel %vm562_vm5, %v559_v11, %v565_v13  ;;  %v590_v17 = vmul.f32 %v843_v4, %v582_v14  ;;  %v607_v33 = vmul.f32 %v844_v24, %v600_v23 }
 0x108   : > { %v579_v18 = vrot.slane %v568_v16, 5  ;;  %v597_v19 = vrot.slane %v568_v16, 3  ;;  %v576_v22 = vmul.f32 %v842_v15, %v568_v16 }
 0x109   : > { %v593_v30 = vadd.f32 %v590_v17, %v575_v21 }
 0x10a   : > { %v583_v25 = vsel %vm580_vm4, %v579_v18, %v577_v9  ;;  %v599_v26 = vsel %vm598_vm6, %v596_v12, %v597_v19  ;;  %v581_v27 = vsel %vm580_vm4, %v578_v10, %v579_v18  ;;  %v601_v28 = vsel %vm598_vm6, %v597_v19, %v595_v6 }
 0x10b   : > { %v589_v29 = vmul.f32 %v843_v4, %v583_v25  ;;  %v608_v31 = vmul.f32 %v844_v24, %v599_v26  ;;  %v591_v32 = vmul.f32 %v843_v4, %v581_v27  ;;  %v609_v37 = vmul.f32 %v844_v24, %v601_v28 }
 0x10d   : > { %v592_v34 = vadd.f32 %v589_v29, %v574_v20  ;;  %v611_v35 = vadd.f32 %v608_v31, %v593_v30  ;;  %v594_v36 = vadd.f32 %v591_v32, %v576_v22 }
 0x10f   : > { %v610_v38 = vadd.f32 %v607_v33, %v592_v34  ;;  %v612_v39 = vadd.f32 %v609_v37, %v594_v36 }
 0x111   : > { %874 = vmatmul.mubr.msk.f32.vlgmr.msra.gmra.mrb[0].mxu1 %vm454_vm7, %v610_v38 }
 0x112   : > { %876 = vmatprep.mubr.msk.f32.mxu1 %vm965_vm1, %v964_v1 }
 0x115   : > { %877 = vmatmul.mubr.msk.f32.gmra.mrb[2].mxu1 %vm454_vm7, %v611_v35 }
 0x116   : > { %879 = vmatprep.mubr.msk.f32.mxu1 %vm965_vm1, %v964_v1 }
 0x119   : > { %880 = vmatmul.mubr.msk.f32.gmra.mrb[4].mxu1 %vm454_vm7, %v612_v39 }
 0x1e4   : > { %v699_v3 = vpop.f32.mrb[0].mxu1 }
 0x1e5   : > { %v875_v40 = vpop.f32.mrb[1].mxu1 }
 0x1e8   : > { %v703_v42 = vpop.f32.mrb[2].mxu1 }
 0x1e9   : > { %v704_v43 = vadd.f32 %v845_v41, %v703_v42  ;;  %v878_v44 = vpop.f32.mrb[3].mxu1 }
 0x1eb   : > { %v711_v45 = vadd.f32 %v704_v43, %v558_v62 }
 0x1ec   : > { %v708_v46 = vpop.f32.mrb[4].mxu1 }
 0x1ed   : > { %712 = vst.msk [vmem:[%s370_s21] sm:$0xff] %vm454_vm7, %v711_v45  ;;  %v881_v1 = vpop.f32.mrb[5].mxu1 }
 0x1ee PF: > { %s18_s9 = sadd.s32 1, %s962_s9   ;;  %s1184_s27 = smov %s954_s29 }
 0x1ef   : > { %p15_p7 = scmp.ge.s32.totalorder %s18_s9, 6   ;;  %s1185_s28 = smov %s958_s30 }
 0x1f0   : > { %s1186_s29 = smov %s1189_s10  ;;  %s1187_s30 = smov %s1193_s11 }
 0x1f1   :  { %17 = sbr.rel (!%p15_p7) target bundleno = 3 (0x3), region = 85 }

</bundles_post_ra>
